<compile_context>
chip_gen: v7x
topology: tpu7x:2x2x1
jax: 0.10.0
libtpu: 0.0.40
codegen_flags: <defaults>
</compile_context>

<pallas_src>
import functools
import math

import jax
import jax.numpy as jnp
from jax.experimental import pallas as pl
from jax.experimental.pallas import tpu as pltpu


def _trunk_fc_kernel(x_ref, w_ref, b_ref, o_ref):
    # x_ref: (TM, R*P)  w_ref: (R*P, R*W)  b_ref: (1, R*W)  o_ref: (TM, R*W)
    x = x_ref[...].astype(jnp.float32)
    y = jnp.dot(x, w_ref[...], preferred_element_type=jnp.float32)   # MXU
    o_ref[...] = (y + b_ref[...]).astype(o_ref.dtype)


def _pack_factor(width, target_lanes=256):
    """Rows packed per output slab so the slab width is a multiple of 128."""
    lane = 128
    r = lane // math.gcd(width, lane)      # smallest R with R*width % 128 == 0
    while r * width < target_lanes:
        r *= 2
    return r


@functools.partial(jax.jit, static_argnames=("tm",))
def trunk_net_forward(x, weight, bias, *, tm=8192):
    """x: (B, num_parameter); weight: (width, num_parameter); bias: (width,).

    Returns (B, width, 1, 1), matching TrunkNet.forward.
    """
    B, P = x.shape
    W = weight.shape[0]

    R = _pack_factor(W)
    slab = R * W

    # Plain-XLA fast path: tiny batches (fixed pallas_call overhead dominates a
    # single grid step) or batches that don't admit the free packing reshape.
    use_pallas = (B % R == 0) and (B // R >= 8) and (slab <= 512)
    if not use_pallas:
        y = jnp.dot(x.astype(jnp.float32), weight.T.astype(jnp.float32))
        y = y + bias.astype(jnp.float32)
        return y.reshape(B, W, 1, 1)

    Mp = B // R                                      # packed row count
    x_p = x.reshape(Mp, R * P)                       # free row-major reshape

    # Block-diagonal replicated weight + tiled bias (tiny; hoist if static).
    w_blk = jnp.kron(jnp.eye(R, dtype=jnp.float32),
                     weight.T.astype(jnp.float32))   # (R*P, R*W), exact zeros off-diag
    b_blk = jnp.tile(bias.astype(jnp.float32), R).reshape(1, slab)

    # Packed-row tile: big (amortize per-step overhead), multiple of 8, and
    # small enough that the grid has >= 2 steps (v7x megacore) when possible.
    tm_p = max(8, min(tm // R, Mp) // 8 * 8)
    if Mp > 8 and pl.cdiv(Mp, tm_p) < 2:
        tm_p = max(8, pl.cdiv(Mp, 2) // 8 * 8)
    grid = (pl.cdiv(Mp, tm_p),)                      # trailing partial block handled by Pallas

    out_p = pl.pallas_call(
        _trunk_fc_kernel,
        out_shape=jax.ShapeDtypeStruct((Mp, slab), jnp.float32),
        grid_spec=pltpu.PrefetchScalarGridSpec(
            num_scalar_prefetch=0,
            grid=grid,
            in_specs=[
                pl.BlockSpec((tm_p, R * P), lambda i: (i, 0)),
                pl.BlockSpec((R * P, slab), lambda i: (0, 0)),   # VMEM-resident
                pl.BlockSpec((1, slab), lambda i: (0, 0)),       # VMEM-resident
            ],
            out_specs=pl.BlockSpec((tm_p, slab), lambda i: (i, 0)),
        ),
        compiler_params=pltpu.CompilerParams(
            dimension_semantics=("parallel",),
        ),
    )(x_p, w_blk, b_blk)

    return out_p.reshape(B, W, 1, 1)                 # free reshapes, no copy


def trunk_net_reference(x, weight, bias):
    """Plain-JAX reference mirroring the PyTorch module exactly."""
    y = jnp.dot(x.astype(jnp.float32), weight.T.astype(jnp.float32)) + bias
    return y[:, :, None, None]


if __name__ == "__main__":
    key = jax.random.PRNGKey(0)
    k_x, k_w, k_b, k_x2 = jax.random.split(key, 4)

    num_parameter, width = 5, 32
    bound = 1.0 / math.sqrt(float(num_parameter))
    weight = jax.random.uniform(k_w, (width, num_parameter),
                                minval=-bound, maxval=bound, dtype=jnp.float32)
    bias = jax.random.uniform(k_b, (width,),
                              minval=-bound, maxval=bound, dtype=jnp.float32)

    # 1) Pallas path: lane-packed MXU kernel (B % R == 0, multi-step grid).
    B = 2048
    x = jax.random.normal(k_x, (B, num_parameter), dtype=jnp.float32)
    out = jax.block_until_ready(trunk_net_forward(x, weight, bias))
    ref = trunk_net_reference(x, weight, bias)
    assert out.shape == (B, width, 1, 1), out.shape
    assert jnp.allclose(out, ref, atol=1e-5, rtol=1e-5), "Pallas path mismatch"

    # 2) Small-batch fast path (matches the module's tiny-B usage, e.g. B=2).
    B2 = 2
    x2 = jax.random.normal(k_x2, (B2, num_parameter), dtype=jnp.float32)
    out2 = jax.block_until_ready(trunk_net_forward(x2, weight, bias))
    ref2 = trunk_net_reference(x2, weight, bias)
    assert out2.shape == (B2, width, 1, 1), out2.shape
    assert jnp.allclose(out2, ref2, atol=1e-5, rtol=1e-5), "fallback mismatch"

    print("KERNEL_OK")
</pallas_src>

<mosaic_0001>
module attributes {stable_mosaic.version = 11 : i64} {
  func.func @_trunk_fc_kernel(%arg0: i32, %arg1: memref<128x40xf32, #tpu.memory_space<vmem>>, %arg2: memref<40x256xf32, #tpu.memory_space<vmem>>, %arg3: memref<1x256xf32, #tpu.memory_space<vmem>>, %arg4: memref<128x256xf32, #tpu.memory_space<vmem>>) attributes {dimension_semantics = [#tpu.dimension_semantics<parallel>], iteration_bounds = array<i64: 2>, scalar_prefetch = 0 : i64, scratch_operands = 0 : i64, tpu.core_type = #tpu.core_type<tc>, window_params = [{transform_indices = @transform_0, window_bounds = array<i64: 128, 40>}, {pipeline_mode = #tpu.pipeline_mode<synchronous>, transform_indices = @transform_1, window_bounds = array<i64: 40, 256>}, {pipeline_mode = #tpu.pipeline_mode<synchronous>, transform_indices = @transform_2, window_bounds = array<i64: 1, 256>}, {transform_indices = @transform_3, window_bounds = array<i64: 128, 256>}]} {
    %c0 = arith.constant 0 : index
    %c0_0 = arith.constant 0 : index
    %0 = vector.load %arg1[%c0, %c0_0] : memref<128x40xf32, #tpu.memory_space<vmem>>, vector<128x40xf32>
    %c0_1 = arith.constant 0 : index
    %c0_2 = arith.constant 0 : index
    %1 = vector.load %arg2[%c0_1, %c0_2] : memref<40x256xf32, #tpu.memory_space<vmem>>, vector<40x256xf32>
    %cst = arith.constant dense<0.000000e+00> : vector<128x256xf32>
    %2 = tpu.matmul %0, %1, %cst {dimension_numbers = #tpu.dot_dimension_numbers<[1], [0], [0], [1], [0, 0, 1, 1], [], []>} : vector<128x40xf32>, vector<40x256xf32>, vector<128x256xf32> -> vector<128x256xf32>
    %c0_3 = arith.constant 0 : index
    %c0_4 = arith.constant 0 : index
    %3 = vector.load %arg3[%c0_3, %c0_4] : memref<1x256xf32, #tpu.memory_space<vmem>>, vector<1x256xf32>
    %4 = vector.broadcast %3 : vector<1x256xf32> to vector<128x256xf32>
    %5 = arith.addf %2, %4 : vector<128x256xf32>
    %c0_5 = arith.constant 0 : index
    %c0_6 = arith.constant 0 : index
    %6 = vector.load %arg4[%c0_5, %c0_6] : memref<128x256xf32, #tpu.memory_space<vmem>>, vector<128x256xf32>
    tpu.vector_store %arg4[%c0_5, %c0_6], %5 {strides = array<i32>} : memref<128x256xf32, #tpu.memory_space<vmem>>, vector<128x256xf32>,
    return
  }
  func.func @transform_0(%arg0: i32) -> (i32, i32) {
    %c0_i32 = arith.constant 0 : i32
    %c0_i32_0 = arith.constant 0 : i32
    return %arg0, %c0_i32 : i32, i32
  }
  func.func @transform_1(%arg0: i32) -> (i32, i32) {
    %c0_i32 = arith.constant 0 : i32
    %c0_i32_0 = arith.constant 0 : i32
    %c0_i32_1 = arith.constant 0 : i32
    return %c0_i32, %c0_i32_0 : i32, i32
  }
  func.func @transform_2(%arg0: i32) -> (i32, i32) {
    %c0_i32 = arith.constant 0 : i32
    %c0_i32_0 = arith.constant 0 : i32
    %c0_i32_1 = arith.constant 0 : i32
    return %c0_i32, %c0_i32_0 : i32, i32
  }
  func.func @transform_3(%arg0: i32) -> (i32, i32) {
    %c0_i32 = arith.constant 0 : i32
    %c0_i32_0 = arith.constant 0 : i32
    return %arg0, %c0_i32 : i32, i32
  }
}

</mosaic_0001>

<bundles_post_ra>
// kernel: tile.9
= control target key start
LH: loop header
LB: loop body
LE: loop exit
PB: predicated region body
PF: predicated region fallthrough
CT: control target
= control target key end

     0   :  { %s7_s6 = smov 3  ;;  %s14_s9 = smov 3  ;;  %vm4_vm0 = vcmask 261120   ;;  %vm11_vm1 = vcmask 1048320   ;;  %vm18_vm2 = vcmask 785920   ;;  %vm25_vm3 = vcmask 523520   ;;  %s76_s0 = inlined_call_operand.vmem [shape: f32[8,32], index: 0, kind: input, shape index: {}]   ;;  %s77_s1 = inlined_call_operand.vmem [shape: f32[1,256], index: 1, kind: output, shape index: {}]  }
   0x1   :  { %v38_v0 = vld [vmem:[%s76_s0 + $0x3] ss:$4 sm:%s7_s6]   ;;  %s45_s10 = smov 96   ;;  %s21_s11 = smov 3  ;;  %v39_v1 = vld [vmem:[%s76_s0 + $0x2] ss:$4 sm:%s14_s9]  }
   0x2   :  { %9 = vrot.lane.b32.xlu0 %v38_v0, %s45_s10  ;;  %v40_v2 = vld [vmem:[%s76_s0 + $0x1] ss:$4 sm:%s21_s11]   ;;  %s2_s16 = smov 3  ;;  %s46_s17 = smov 32  }
   0x3   :  { %23 = vrot.lane.b32.xlu1 %v40_v2, %s46_s17  ;;  %v3_v3 = vld [vmem:[%s76_s0] ss:$4 sm:%s2_s16]   ;;  %s47_s0 = smov 64  }
   0x4   :  { %5 = vst.msk [vmem:[#allocation0] ss:$8 sm:$0x3] %vm4_vm0, %v3_v3  }
   0x6   :  { %16 = vrot.lane.b32.xlu0 %v39_v1, %s47_s0 }
  0x74   :  { %v10_v4 = vpop.permute.xlu0 %9  }
  0x75   :  { %12 = vst.msk [vmem:[#allocation0] ss:$8 sm:$0x3] %vm11_vm1, %v10_v4   ;;  %v24_v5 = vpop.permute.xlu1 %23  }
  0x78   :  { %v17_v6 = vpop.permute.xlu0 %16  }
  0x79   :  { %19 = vst.msk [vmem:[#allocation0] ss:$8 sm:$0x3] %vm18_vm2, %v17_v6  }
  0x7a   :  { %26 = vst.msk [vmem:[#allocation0] ss:$8 sm:$0x3] %vm25_vm3, %v24_v5  }
  0x81   :  { %v30_v7 = vld [vmem:[#allocation0] sm:$0x1]  ;;  %v34_v8 = vld [vmem:[#allocation0 + $0x8] sm:$0x1] }
  0x82   :  { %32 = vst [vmem:[%s77_s1] sm:$0x1] %v30_v7  ;;  %41 = vst [vmem:[%s77_s1 + $0x1] sm:$0x1] %v34_v8 }

// kernel: tile.8
= control target key start
LH: loop header
LB: loop body
LE: loop exit
PB: predicated region body
PF: predicated region fallthrough
CT: control target
= control target key end

     0   :  { %s22_s0 = inlined_call_operand.vmem [shape: f32[32], index: 0, kind: input, shape index: {}]   ;;  %s23_s1 = inlined_call_operand.vmem [shape: f32[8,32], index: 1, kind: output, shape index: {}]  }
   0x1   :  { %v4_v0 = vld [vmem:[%s22_s0] ss:$0 sm:$0xff] }
   0x2   :  { %5 = vst [vmem:[%s23_s1] sm:$0xff] %v4_v0 }

// kernel: trunk_net_forward.1
= control target key start
LH: loop header
LB: loop body
LE: loop exit
PB: predicated region body
PF: predicated region fallthrough
CT: control target
= control target key end

     0   :  { %s595_s12 = smov 0   ;;  %s769_s0 = inlined_call_operand.vmem [shape: f32[256,40], index: 0, kind: input, shape index: {}]   ;;  %s770_s1 = inlined_call_operand.vmem [shape: f32[40,256], index: 1, kind: input, shape index: {}]   ;;  %s771_s2 = inlined_call_operand.vmem [shape: f32[1,256], index: 2, kind: input, shape index: {}]   ;;  %s772_s3 = inlined_call_operand.vmem [shape: f32[256,256], index: 3, kind: output, shape index: {}]  }
   0x1 LB: > { %s514_s13 = sadd.s32 4294967295, %s572_s12   ;;  %p518_p0 = scmp.ge.s32.totalorder %s572_s12, 1  ;;  %s572_s12 = sphi %s595_s12, %s13_s12  }
   0x2   : > { %p138_p1 = scmp.lt.s32.totalorder %s572_s12, 3 }
   0x4   : > { %p139_p2 = pnand %p518_p0, %p138_p1 }
   0x5   : > { %v193_v0 = vld [vmem:[%s770_s1 + $0x8] sm:$0xff] (!%p139_p2)  ;;  %v195_v1 = vld [vmem:[%s770_s1 + $0x18] sm:$0xff] (!%p139_p2)  ;;  %v192_v2 = vld [vmem:[%s770_s1] sm:$0xff] (!%p139_p2)  ;;  %s519_s20 = sshll.u32 (!%p139_p2), %s514_s13, 4  ;;  %v574_v7 = vmov (!%p139_p2), 0.0   ;;  %vm214_vm0 = vcmask (!%p139_p2), 326656   ;;  %v204_v31 = vlaneseq (!%p139_p2) }
   0x6   : > { %142 = sbr.rel (%p139_p2) target bundleno = 262 (0x106), region = 32  ;;  %v543_v3 = vpack.c.bf16 (!%p139_p2), %v195_v1, %v193_v0  ;;  %v194_v4 = vld [vmem:[%s770_s1 + $0x10] sm:$0xff] (!%p139_p2)  ;;  %v197_v5 = vld [vmem:[%s770_s1 + $0x28] sm:$0xff] (!%p139_p2)  ;;  %v199_v6 = vld [vmem:[%s770_s1 + $0x38] sm:$0xff] (!%p139_p2)  ;;  %327 = vmatprep.mubr.f32.mxu0 (!%p139_p2), %v574_v7  ;;  %375 = vmatprep.mubr.f32.mxu1 (!%p139_p2), %v574_v7  ;;  %p164_p3 = scmp.lt.s32.totalorder (!%p139_p2), %s519_s20, 31 }
   0x7   : > { %v545_v8 = vpack.c.bf16 (!%p139_p2), %v194_v4, %v192_v2  ;;  %v547_v9 = vpack.c.bf16 (!%p139_p2), %v199_v6, %v197_v5  ;;  %v196_v10 = vld [vmem:[%s770_s1 + $0x20] sm:$0xff] (!%p139_p2)  ;;  %v198_v11 = vld [vmem:[%s770_s1 + $0x30] sm:$0xff] (!%p139_p2)  ;;  %v201_v13 = vld [vmem:[%s770_s1 + $0x48] sm:$0xff] (!%p139_p2)  ;;  %v205_v32 = vshrl.u32 (!%p139_p2), %v204_v31, 7 }
   0x8   : > { %544 = vmatprep.subr.bf16.mxu0 (!%p139_p2), %v543_v3  ;;  %551 = vmatprep.subr.bf16.mxu1 (!%p139_p2), %v543_v3  ;;  %v549_v12 = vpack.c.bf16 (!%p139_p2), %v198_v11, %v196_v10  ;;  %v200_v14 = vld [vmem:[%s770_s1 + $0x40] sm:$0xff] (!%p139_p2) }
   0x9   : > { %546 = vmatpush1.bf16.msra.mxu0 (!%p139_p2), %v545_v8  ;;  %554 = vmatpush1.bf16.msra.mxu1 (!%p139_p2), %v545_v8  ;;  %v206_v33 = vsub.s32 (!%p139_p2), 0, %v205_v32  ;;  %v202_v34 = vld [vmem:[%s771_s2] sm:$0x3] (!%p139_p2)  ;;  %v210_v35 = vsub.s32 (!%p139_p2), 1, %v205_v32 }
   0xa   : > { %548 = vmatprep.subr.bf16.mxu0 (!%p139_p2), %v547_v9  ;;  %552 = vmatprep.subr.bf16.mxu1 (!%p139_p2), %v547_v9 }
   0xb   : > { %v693_v36 = vrot.slane (!%p139_p2), %v202_v34, %v206_v33  ;;  %v695_v37 = vrot.slane (!%p139_p2), %v202_v34, %v210_v35 }
   0xd   : > { %s774_s20 = smov (!%p164_p3, %s519_s20), 31  ;;  %550 = vmatpush1.bf16.msra.mxu0 %v549_v12  ;;  %555 = vmatpush1.bf16.msra.mxu1 %v549_v12 }
   0xe   : > { %s520_s4 = sshll.u32 %s774_s20, 3  ;;  %271 = vmatprep.subr.mxu0 %v201_v13  ;;  %553 = vmatprep.subr.mxu1 %v201_v13  ;;  %s542_s15 = sshll.u32 %s774_s20, 4 }
   0xf   : > { %s638_s9 = scalar_lea.vmem %s769_s0, %s520_s4  ;;  %s700_s18 = scalar_lea.vmem %s772_s3, %s542_s15 }
  0x10   : > { %v176_v15 = vld [vmem:[%s638_s9] sm:$0xff]  ;;  %v177_v17 = vld [vmem:[%s638_s9 + $0x8] sm:$0xff]  ;;  %v178_v19 = vld [vmem:[%s638_s9 + $0x10] sm:$0xff] }
  0x11   : > { %v184_v16 = vld [vmem:[%s638_s9 + $0x40] sm:$0xff]  ;;  %272 = vmatpush1.msra.mxu0 %v200_v14  ;;  %556 = vmatpush1.msra.mxu1 %v200_v14  ;;  %v185_v18 = vld [vmem:[%s638_s9 + $0x48] sm:$0xff]  ;;  %v186_v20 = vld [vmem:[%s638_s9 + $0x50] sm:$0xff] }
  0x12   : > { %524 = vmatmul.mubr.msk.f32.vlgmr.msra.gmra.mrb[0].mxu0 %vm214_vm0, %v176_v15  ;;  %532 = vmatmul.mubr.msk.f32.vlgmr.msra.gmra.mrb[0].mxu1 %vm214_vm0, %v184_v16  ;;  %v179_v21 = vld [vmem:[%s638_s9 + $0x18] sm:$0xff]  ;;  %v180_v23 = vld [vmem:[%s638_s9 + $0x20] sm:$0xff]  ;;  %v181_v25 = vld [vmem:[%s638_s9 + $0x28] sm:$0xff] }
  0x13   : > { %333 = vmatprep.mubr.f32.mxu0 %v574_v7  ;;  %381 = vmatprep.mubr.f32.mxu1 %v574_v7  ;;  %v187_v22 = vld [vmem:[%s638_s9 + $0x58] sm:$0xff]  ;;  %v188_v24 = vld [vmem:[%s638_s9 + $0x60] sm:$0xff]  ;;  %v189_v26 = vld [vmem:[%s638_s9 + $0x68] sm:$0xff] }
  0x14   : > { %v182_v27 = vld [vmem:[%s638_s9 + $0x30] sm:$0xff]  ;;  %v183_v29 = vld [vmem:[%s638_s9 + $0x38] sm:$0xff] }
  0x15   : > { %v190_v28 = vld [vmem:[%s638_s9 + $0x70] sm:$0xff]  ;;  %v191_v30 = vld [vmem:[%s638_s9 + $0x78] sm:$0xff] }
  0x16   : > { %525 = vmatmul.mubr.msk.f32.gmra.mrb[2].mxu0 %vm214_vm0, %v177_v17  ;;  %533 = vmatmul.mubr.msk.f32.gmra.mrb[2].mxu1 %vm214_vm0, %v185_v18 }
  0x17   : > { %339 = vmatprep.mubr.f32.mxu0 %v574_v7  ;;  %387 = vmatprep.mubr.f32.mxu1 %v574_v7 }
  0x1a   : > { %526 = vmatmul.mubr.msk.f32.gmra.mrb[4].mxu0 %vm214_vm0, %v178_v19  ;;  %534 = vmatmul.mubr.msk.f32.gmra.mrb[4].mxu1 %vm214_vm0, %v186_v20 }
  0x1b   : > { %345 = vmatprep.mubr.f32.mxu0 %v574_v7  ;;  %393 = vmatprep.mubr.f32.mxu1 %v574_v7 }
  0x1e   : > { %527 = vmatmul.mubr.msk.f32.gmra.mrb[6].mxu0 %vm214_vm0, %v179_v21  ;;  %535 = vmatmul.mubr.msk.f32.gmra.mrb[6].mxu1 %vm214_vm0, %v187_v22 }
  0x1f   : > { %351 = vmatprep.mubr.f32.mxu0 %v574_v7  ;;  %399 = vmatprep.mubr.f32.mxu1 %v574_v7 }
  0x22   : > { %528 = vmatmul.mubr.msk.f32.gmra.mrb[8].mxu0 %vm214_vm0, %v180_v23  ;;  %536 = vmatmul.mubr.msk.f32.gmra.mrb[8].mxu1 %vm214_vm0, %v188_v24 }
  0x23   : > { %357 = vmatprep.mubr.f32.mxu0 %v574_v7  ;;  %405 = vmatprep.mubr.f32.mxu1 %v574_v7 }
  0x26   : > { %529 = vmatmul.mubr.msk.f32.gmra.mrb[10].mxu0 %vm214_vm0, %v181_v25  ;;  %537 = vmatmul.mubr.msk.f32.gmra.mrb[10].mxu1 %vm214_vm0, %v189_v26 }
  0x27   : > { %363 = vmatprep.mubr.f32.mxu0 %v574_v7  ;;  %411 = vmatprep.mubr.f32.mxu1 %v574_v7 }
  0x2a   : > { %530 = vmatmul.mubr.msk.f32.gmra.mrb[12].mxu0 %vm214_vm0, %v182_v27  ;;  %538 = vmatmul.mubr.msk.f32.gmra.mrb[12].mxu1 %vm214_vm0, %v190_v28 }
  0x2b   : > { %369 = vmatprep.mubr.f32.mxu0 %v574_v7  ;;  %417 = vmatprep.mubr.f32.mxu1 %v574_v7 }
  0x2e   : > { %531 = vmatmul.mubr.msk.f32.gmra.mrb[14].mxu0 %vm214_vm0, %v183_v29  ;;  %539 = vmatmul.mubr.msk.f32.gmra.mrb[14].mxu1 %vm214_vm0, %v191_v30 }
  0xe5   : > { %v329_v38 = vpop.f32.mrb[0].mxu0  ;;  %v377_v39 = vpop.f32.mrb[0].mxu1 }
  0xe6   : > { %v330_v40 = vadd.f32 %v329_v38, %v693_v36  ;;  %v378_v41 = vadd.f32 %v377_v39, %v693_v36  ;;  %v331_v42 = vpop.f32.mrb[1].mxu0  ;;  %v379_v43 = vpop.f32.mrb[1].mxu1 }
  0xe7   : > { %v332_v44 = vadd.f32 %v331_v42, %v695_v37  ;;  %v380_v45 = vadd.f32 %v379_v43, %v695_v37 }
  0xe8   : > { %424 = vst [vmem:[%s700_s18] sm:$0xff] %v330_v40  ;;  %440 = vst [vmem:[%s700_s18 + $0x80] sm:$0xff] %v378_v41 }
  0xe9   : > { %425 = vst [vmem:[%s700_s18 + $0x8] sm:$0xff] %v332_v44  ;;  %441 = vst [vmem:[%s700_s18 + $0x88] sm:$0xff] %v380_v45  ;;  %v335_v46 = vpop.f32.mrb[2].mxu0  ;;  %v383_v47 = vpop.f32.mrb[2].mxu1 }
  0xea   : > { %v336_v48 = vadd.f32 %v335_v46, %v693_v36  ;;  %v384_v49 = vadd.f32 %v383_v47, %v693_v36  ;;  %v337_v50 = vpop.f32.mrb[3].mxu0  ;;  %v385_v51 = vpop.f32.mrb[3].mxu1 }
  0xeb   : > { %v338_v52 = vadd.f32 %v337_v50, %v695_v37  ;;  %v386_v53 = vadd.f32 %v385_v51, %v695_v37 }
  0xec   : > { %426 = vst [vmem:[%s700_s18 + $0x10] sm:$0xff] %v336_v48  ;;  %442 = vst [vmem:[%s700_s18 + $0x90] sm:$0xff] %v384_v49 }
  0xed   : > { %427 = vst [vmem:[%s700_s18 + $0x18] sm:$0xff] %v338_v52  ;;  %443 = vst [vmem:[%s700_s18 + $0x98] sm:$0xff] %v386_v53  ;;  %v341_v54 = vpop.f32.mrb[4].mxu0  ;;  %v389_v55 = vpop.f32.mrb[4].mxu1 }
  0xee   : > { %v342_v56 = vadd.f32 %v341_v54, %v693_v36  ;;  %v390_v57 = vadd.f32 %v389_v55, %v693_v36  ;;  %v343_v58 = vpop.f32.mrb[5].mxu0  ;;  %v391_v59 = vpop.f32.mrb[5].mxu1 }
  0xef   : > { %v344_v60 = vadd.f32 %v343_v58, %v695_v37  ;;  %v392_v61 = vadd.f32 %v391_v59, %v695_v37 }
  0xf0   : > { %428 = vst [vmem:[%s700_s18 + $0x20] sm:$0xff] %v342_v56  ;;  %444 = vst [vmem:[%s700_s18 + $0xa0] sm:$0xff] %v390_v57 }
  0xf1   : > { %429 = vst [vmem:[%s700_s18 + $0x28] sm:$0xff] %v344_v60  ;;  %445 = vst [vmem:[%s700_s18 + $0xa8] sm:$0xff] %v392_v61  ;;  %v347_v62 = vpop.f32.mrb[6].mxu0  ;;  %v395_v63 = vpop.f32.mrb[6].mxu1 }
  0xf2   : > { %v348_v0 = vadd.f32 %v347_v62, %v693_v36  ;;  %v396_v1 = vadd.f32 %v395_v63, %v693_v36  ;;  %v349_v2 = vpop.f32.mrb[7].mxu0  ;;  %v397_v3 = vpop.f32.mrb[7].mxu1 }
  0xf3   : > { %v350_v4 = vadd.f32 %v349_v2, %v695_v37  ;;  %v398_v5 = vadd.f32 %v397_v3, %v695_v37 }
  0xf4   : > { %430 = vst [vmem:[%s700_s18 + $0x30] sm:$0xff] %v348_v0  ;;  %446 = vst [vmem:[%s700_s18 + $0xb0] sm:$0xff] %v396_v1 }
  0xf5   : > { %431 = vst [vmem:[%s700_s18 + $0x38] sm:$0xff] %v350_v4  ;;  %447 = vst [vmem:[%s700_s18 + $0xb8] sm:$0xff] %v398_v5  ;;  %v353_v6 = vpop.f32.mrb[8].mxu0  ;;  %v401_v7 = vpop.f32.mrb[8].mxu1 }
  0xf6   : > { %v354_v8 = vadd.f32 %v353_v6, %v693_v36  ;;  %v402_v9 = vadd.f32 %v401_v7, %v693_v36  ;;  %v355_v10 = vpop.f32.mrb[9].mxu0  ;;  %v403_v11 = vpop.f32.mrb[9].mxu1 }
  0xf7   : > { %v356_v12 = vadd.f32 %v355_v10, %v695_v37  ;;  %v404_v13 = vadd.f32 %v403_v11, %v695_v37 }
  0xf8   : > { %432 = vst [vmem:[%s700_s18 + $0x40] sm:$0xff] %v354_v8  ;;  %448 = vst [vmem:[%s700_s18 + $0xc0] sm:$0xff] %v402_v9 }
  0xf9   : > { %433 = vst [vmem:[%s700_s18 + $0x48] sm:$0xff] %v356_v12  ;;  %449 = vst [vmem:[%s700_s18 + $0xc8] sm:$0xff] %v404_v13  ;;  %v359_v14 = vpop.f32.mrb[10].mxu0  ;;  %v407_v15 = vpop.f32.mrb[10].mxu1 }
  0xfa   : > { %v360_v16 = vadd.f32 %v359_v14, %v693_v36  ;;  %v408_v17 = vadd.f32 %v407_v15, %v693_v36  ;;  %v361_v18 = vpop.f32.mrb[11].mxu0  ;;  %v409_v19 = vpop.f32.mrb[11].mxu1 }
  0xfb   : > { %v362_v20 = vadd.f32 %v361_v18, %v695_v37  ;;  %v410_v21 = vadd.f32 %v409_v19, %v695_v37 }
  0xfc   : > { %434 = vst [vmem:[%s700_s18 + $0x50] sm:$0xff] %v360_v16  ;;  %450 = vst [vmem:[%s700_s18 + $0xd0] sm:$0xff] %v408_v17 }
  0xfd   : > { %435 = vst [vmem:[%s700_s18 + $0x58] sm:$0xff] %v362_v20  ;;  %451 = vst [vmem:[%s700_s18 + $0xd8] sm:$0xff] %v410_v21  ;;  %v365_v22 = vpop.f32.mrb[12].mxu0  ;;  %v413_v23 = vpop.f32.mrb[12].mxu1 }
  0xfe   : > { %v366_v24 = vadd.f32 %v365_v22, %v693_v36  ;;  %v414_v25 = vadd.f32 %v413_v23, %v693_v36  ;;  %v367_v26 = vpop.f32.mrb[13].mxu0  ;;  %v415_v27 = vpop.f32.mrb[13].mxu1 }
  0xff   : > { %v368_v28 = vadd.f32 %v367_v26, %v695_v37  ;;  %v416_v29 = vadd.f32 %v415_v27, %v695_v37 }
 0x100   : > { %436 = vst [vmem:[%s700_s18 + $0x60] sm:$0xff] %v366_v24  ;;  %452 = vst [vmem:[%s700_s18 + $0xe0] sm:$0xff] %v414_v25 }
 0x101   : > { %437 = vst [vmem:[%s700_s18 + $0x68] sm:$0xff] %v368_v28  ;;  %453 = vst [vmem:[%s700_s18 + $0xe8] sm:$0xff] %v416_v29  ;;  %v371_v30 = vpop.f32.mrb[14].mxu0  ;;  %v419_v31 = vpop.f32.mrb[14].mxu1 }
 0x102   : > { %v372_v32 = vadd.f32 %v371_v30, %v693_v36  ;;  %v420_v33 = vadd.f32 %v419_v31, %v693_v36  ;;  %v373_v34 = vpop.f32.mrb[15].mxu0  ;;  %v421_v35 = vpop.f32.mrb[15].mxu1 }
 0x103   : > { %v374_v38 = vadd.f32 %v373_v34, %v695_v37  ;;  %v422_v39 = vadd.f32 %v421_v35, %v695_v37 }
 0x104   : > { %438 = vst [vmem:[%s700_s18 + $0x70] sm:$0xff] %v372_v32  ;;  %454 = vst [vmem:[%s700_s18 + $0xf0] sm:$0xff] %v420_v33 }
 0x105   : > { %439 = vst [vmem:[%s700_s18 + $0x78] sm:$0xff] %v374_v38  ;;  %455 = vst [vmem:[%s700_s18 + $0xf8] sm:$0xff] %v422_v39 }
 0x106 PF: > { %s13_s12 = sadd.s32 1, %s572_s12  }
 0x107   : > { %p10_p4 = scmp.ge.s32.totalorder %s13_s12, 4  }
 0x109   :  { %12 = sbr.rel (!%p10_p4) target bundleno = 1 (0x1), region = 62 }

</bundles_post_ra>
